<compile_context>
chip_gen: v6e
topology: v6e:2x2x1
jax: 0.10.0
libtpu: 0.0.40
codegen_flags: <defaults>
</compile_context>

<pallas_src>
import math
from functools import partial

import jax
import jax.numpy as jnp
from jax.experimental import pallas as pl
from jax.experimental.pallas import tpu as pltpu


def _round_up(x, m):
    return ((x + m - 1) // m) * m


# ----------------------------- Pallas kernel --------------------------------
def _patch_embed_kernel(x_ref, w_ref, pe_ref, o_ref, *,
                        num_groups, k_g, group_stride, n_g, compute_dtype):
    # x_ref : (tile, L_need)          padded series rows (VMEM, read once per row tile)
    # w_ref : (k_g, n_g)              block-banded value-embedding weight (constant)
    # pe_ref: (1, num_groups * n_g)   flattened positional embedding (constant)
    # o_ref : (tile, num_groups * n_g) output rows
    w = w_ref[...]
    if compute_dtype is not None:
        w = w.astype(compute_dtype)
    for gi in range(num_groups):                       # static unroll over patch groups
        start = gi * group_stride
        xs = x_ref[:, start:start + k_g]               # one contiguous window -> g patches
        if compute_dtype is not None:
            xs = xs.astype(compute_dtype)
        y = jnp.dot(xs, w, preferred_element_type=jnp.float32)   # MXU, f32 accumulation
        y = y + pe_ref[:, gi * n_g:(gi + 1) * n_g]               # fused PE add (VPU)
        o_ref[:, gi * n_g:(gi + 1) * n_g] = y.astype(o_ref.dtype)  # direct per-group store


# ----------------------------- pallas_call wrapper ---------------------------
def patch_embedding_pallas(x_rows, w_band, pe_flat, *, num_groups, k_g, group_stride, n_g,
                           out_dtype=jnp.float32, compute_dtype=None,
                           tile=None, vmem_limit_bytes=None):
    """x_rows: (BN, L_need) padded rows, w_band: (k_g, n_g) banded weight,
    pe_flat: (1, num_groups*n_g). Returns (BN, num_groups*n_g)."""
    BN, L_need = x_rows.shape
    PN_pad = num_groups * n_g
    assert w_band.shape == (k_g, n_g)
    assert pe_flat.shape == (1, PN_pad)

    # Generation-aware scoped-VMEM budget: ~55% of physical per-TC VMEM
    # (v5e/v6e 128 MiB -> ~70 MiB, v7x 64 MiB -> ~35 MiB), clamped for safety.
    if vmem_limit_bytes is None:
        try:
            cap = int(pltpu.get_tpu_info().vmem_capacity_bytes)
        except Exception:
            cap = 64 * 1024 * 1024
        vmem_limit_bytes = max(32 * 1024 * 1024, min(96 * 1024 * 1024, int(cap * 0.55)))

    in_bytes = x_rows.dtype.itemsize
    out_bytes = jnp.dtype(out_dtype).itemsize
    w_bytes = w_band.size * w_band.dtype.itemsize
    pe_bytes = pe_flat.size * pe_flat.dtype.itemsize

    if tile is None:
        # Constant-index weight/PE stay resident (still counted double-buffered) and
        # ~2 MiB is reserved for Mosaic internal scratch; the remainder feeds the
        # double-buffered input-row / output-row tiles (no extra //2 halving).
        resident = 2 * (w_bytes + pe_bytes) + 2 * 1024 * 1024
        budget = max(vmem_limit_bytes - resident, 1 * 1024 * 1024)
        per_row = 2 * L_need * in_bytes + 2 * PN_pad * out_bytes
        tile = budget // max(per_row, 1)
        tile = max(8, min(4096, (tile // 8) * 8))
    # Keep >=~4 grid steps so the "parallel" axis can shard across v7x's 2 TCs,
    # and never exceed the (sublane-padded) number of rows.
    tile = min(tile, max(8, _round_up(-(-BN // 4), 8)), _round_up(BN, 8))
    tile = max(8, (tile // 8) * 8)

    BN_pad = _round_up(BN, tile)
    if BN_pad != BN:
        x_rows = jnp.pad(x_rows, ((0, BN_pad - BN), (0, 0)))

    kernel = partial(_patch_embed_kernel, num_groups=num_groups, k_g=k_g,
                     group_stride=group_stride, n_g=n_g, compute_dtype=compute_dtype)

    flops = 2 * BN_pad * num_groups * k_g * n_g
    bytes_accessed = (BN_pad * L_need * in_bytes + w_bytes + pe_bytes
                      + BN_pad * PN_pad * out_bytes)

    out = pl.pallas_call(
        kernel,
        out_shape=jax.ShapeDtypeStruct((BN_pad, PN_pad), out_dtype),
        grid_spec=pltpu.PrefetchScalarGridSpec(
            num_scalar_prefetch=0,
            grid=(BN_pad // tile,),
            in_specs=[
                pl.BlockSpec((tile, L_need), lambda i: (i, 0)),   # padded rows, read once
                pl.BlockSpec((k_g, n_g), lambda i: (0, 0)),       # banded weight (constant)
                pl.BlockSpec((1, PN_pad), lambda i: (0, 0)),      # flattened PE (constant)
            ],
            out_specs=pl.BlockSpec((tile, PN_pad), lambda i: (i, 0)),  # lane-dense output
        ),
        compiler_params=pltpu.CompilerParams(
            dimension_semantics=("parallel",),      # megacore sharding on v7x
            vmem_limit_bytes=vmem_limit_bytes,
        ),
        cost_estimate=pl.CostEstimate(flops=flops, transcendentals=0,
                                      bytes_accessed=bytes_accessed),
    )(x_rows, w_band, pe_flat)

    return out[:BN]


# ------------------------------ JAX glue -------------------------------------
def make_positional_embedding(d_model, max_len=5000):
    """Exact replica of PositionalEmbedding's buffer construction."""
    assert d_model % 2 == 0, "PositionalEmbedding assumes even d_model"
    position = jnp.arange(0, max_len, dtype=jnp.float32)[:, None]
    div_term = jnp.exp(
        jnp.arange(0, d_model, 2, dtype=jnp.float32) * -(math.log(10000.0) / d_model)
    )
    pe = jnp.zeros((max_len, d_model), dtype=jnp.float32)
    pe = pe.at[:, 0::2].set(jnp.sin(position * div_term))
    pe = pe.at[:, 1::2].set(jnp.cos(position * div_term))
    return pe  # (max_len, d_model)


def _default_k_target():
    """Smaller grouped-K on v5e (weaker MXU) so FLOP inflation never flips it MXU-bound."""
    try:
        kind = jax.devices()[0].device_kind.lower()
    except Exception:
        return 256
    if "v5e" in kind or "v5 lite" in kind or "v5lite" in kind:
        return 64
    if "v4" in kind or "v5" in kind:
        return 128
    return 256


def _pick_group_size(num_patches, patch_len, stride, d_model, k_target=256, n_target=512):
    """Group g patches per MXU call: K=(g-1)*stride+patch_len, N=g*d_model.
    Prefer g so that g*d_model is a multiple of 128 lanes (unmasked stores)."""
    lane_unit = max(1, 128 // math.gcd(d_model, 128))
    g_by_k = max(1, (k_target - patch_len) // stride + 1)
    g_by_n = max(1, n_target // d_model)
    g = max(1, min(num_patches, g_by_k, g_by_n))
    if lane_unit > 1 and g >= lane_unit:
        g = (g // lane_unit) * lane_unit
    return g


def patch_embedding_forward(x, weight_T, pe_full, *, patch_len, stride, padding,
                            out_dtype=jnp.float32, compute_dtype=None, group_size=None):
    """x: (B, n_vars, L). weight_T: (patch_len, d_model) == Linear.weight.T."""
    B, n_vars, L = x.shape
    d_model = weight_T.shape[1]

    L_pad = L + padding
    num_patches = (L_pad - patch_len) // stride + 1

    if group_size is None:
        group_size = _pick_group_size(num_patches, patch_len, stride, d_model,
                                      k_target=_default_k_target())
    g = group_size
    num_groups = -(-num_patches // g)
    P_pad = num_groups * g
    k_g = (g - 1) * stride + patch_len
    group_stride = g * stride
    n_g = g * d_model
    L_need = (P_pad - 1) * stride + patch_len

    # nn.ReplicationPad1d((0, padding)): replicate last element `padding` times;
    # extra zero tail only feeds the (discarded) padded patches of the last group.
    pad_tail = jnp.repeat(x[..., -1:], padding, axis=-1)
    x_pad = jnp.concatenate([x, pad_tail], axis=-1)            # (B, n_vars, L_pad)
    if L_need > L_pad:
        x_pad = jnp.pad(x_pad, ((0, 0), (0, 0), (0, L_need - L_pad)))
    x_rows = x_pad.reshape(B * n_vars, L_need)                 # (BN, L_need)

    # Block-banded weight: weight_T at row offset j*stride / column block j for patch j,
    # zeros elsewhere -> one contiguous x slice drives g patches in a single matmul.
    w_band = jnp.zeros((k_g, n_g), dtype=weight_T.dtype)
    for j in range(g):
        w_band = w_band.at[j * stride:j * stride + patch_len,
                           j * d_model:(j + 1) * d_model].set(weight_T)

    pe = pe_full[:num_patches]
    if P_pad > num_patches:
        pe = jnp.pad(pe, ((0, P_pad - num_patches), (0, 0)))
    pe_flat = pe.reshape(1, P_pad * d_model)

    out_flat = patch_embedding_pallas(
        x_rows, w_band, pe_flat,
        num_groups=num_groups, k_g=k_g, group_stride=group_stride, n_g=n_g,
        out_dtype=out_dtype, compute_dtype=compute_dtype,
    )                                                          # (BN, P_pad*d_model)
    out_flat = out_flat[:, :num_patches * d_model]
    out = out_flat.reshape(B * n_vars, num_patches, d_model)   # free XLA reshape
    # TODO(synk): nn.Dropout training-mode mask not reproduced (identity / eval mode).
    return out, n_vars


# ------------------------------ main -----------------------------------------
if __name__ == "__main__":
    # Small shapes consistent with the module.
    B, n_vars, L = 2, 4, 16
    d_model, patch_len, stride, padding = 32, 8, 4, 4

    key = jax.random.PRNGKey(0)
    kx, kw = jax.random.split(key)
    x = jax.random.normal(kx, (B, n_vars, L), dtype=jnp.float32)

    # nn.Linear(patch_len, d_model, bias=False): weight shape (d_model, patch_len).
    bound = 1.0 / math.sqrt(patch_len)
    w = jax.random.uniform(kw, (d_model, patch_len), jnp.float32, -bound, bound)

    # Round test inputs to bf16-representable values so the kernel-vs-reference check
    # is independent of the TPU's default (multi-pass bf16) f32 matmul precision.
    x = x.astype(jnp.bfloat16).astype(jnp.float32)
    w = w.astype(jnp.bfloat16).astype(jnp.float32)
    weight_T = w.T                                              # (patch_len, d_model)

    pe_full = make_positional_embedding(d_model)

    out, nv = patch_embedding_forward(
        x, weight_T, pe_full, patch_len=patch_len, stride=stride, padding=padding
    )
    out = jax.block_until_ready(out)

    # Silent correctness check against a plain-JAX reference (matches the PyTorch module).
    pad_tail = jnp.repeat(x[..., -1:], padding, axis=-1)
    x_pad = jnp.concatenate([x, pad_tail], axis=-1)
    P = (L + padding - patch_len) // stride + 1
    idx = stride * jnp.arange(P)[:, None] + jnp.arange(patch_len)[None, :]
    ref = x_pad[:, :, idx].reshape(B * n_vars, P, patch_len) @ weight_T
    ref = ref + pe_full[:P][None, :, :]

    assert out.shape == (B * n_vars, P, d_model)
    assert nv == n_vars
    assert jnp.allclose(out, ref, atol=1e-4, rtol=1e-4), float(jnp.max(jnp.abs(out - ref)))

    print("KERNEL_OK")
</pallas_src>

<mosaic_0001>
module attributes {stable_mosaic.version = 11 : i64} {
  func.func @_patch_embed_kernel(%arg0: i32, %arg1: memref<8x20xf32, #tpu.memory_space<vmem>>, %arg2: memref<20x128xf32, #tpu.memory_space<vmem>>, %arg3: memref<1x128xf32, #tpu.memory_space<vmem>>, %arg4: memref<8x128xf32, #tpu.memory_space<vmem>>) attributes {dimension_semantics = [#tpu.dimension_semantics<parallel>], iteration_bounds = array<i64: 1>, scalar_prefetch = 0 : i64, scratch_operands = 0 : i64, tpu.core_type = #tpu.core_type<tc>, window_params = [{transform_indices = @transform_0, window_bounds = array<i64: 8, 20>}, {pipeline_mode = #tpu.pipeline_mode<synchronous>, transform_indices = @transform_1, window_bounds = array<i64: 20, 128>}, {pipeline_mode = #tpu.pipeline_mode<synchronous>, transform_indices = @transform_2, window_bounds = array<i64: 1, 128>}, {transform_indices = @transform_3, window_bounds = array<i64: 8, 128>}]} {
    %c0 = arith.constant 0 : index
    %c0_0 = arith.constant 0 : index
    %0 = vector.load %arg2[%c0, %c0_0] : memref<20x128xf32, #tpu.memory_space<vmem>>, vector<20x128xf32>
    %c0_1 = arith.constant 0 : index
    %c0_2 = arith.constant 0 : index
    %1 = vector.load %arg1[%c0_1, %c0_2] : memref<8x20xf32, #tpu.memory_space<vmem>>, vector<8x20xf32>
    %cst = arith.constant dense<0.000000e+00> : vector<8x128xf32>
    %2 = tpu.matmul %1, %0, %cst {dimension_numbers = #tpu.dot_dimension_numbers<[1], [0], [0], [1], [0, 0, 1, 1], [], []>} : vector<8x20xf32>, vector<20x128xf32>, vector<8x128xf32> -> vector<8x128xf32>
    %c0_3 = arith.constant 0 : index
    %c0_4 = arith.constant 0 : index
    %3 = vector.load %arg3[%c0_3, %c0_4] : memref<1x128xf32, #tpu.memory_space<vmem>>, vector<1x128xf32>
    %4 = vector.broadcast %3 : vector<1x128xf32> to vector<8x128xf32>
    %5 = arith.addf %2, %4 : vector<8x128xf32>
    %c0_5 = arith.constant 0 : index
    %c0_6 = arith.constant 0 : index
    %6 = vector.load %arg4[%c0_5, %c0_6] : memref<8x128xf32, #tpu.memory_space<vmem>>, vector<8x128xf32>
    tpu.vector_store %arg4[%c0_5, %c0_6], %5 {strides = array<i32>} : memref<8x128xf32, #tpu.memory_space<vmem>>, vector<8x128xf32>,
    return
  }
  func.func @transform_0(%arg0: i32) -> (i32, i32) {
    %c0_i32 = arith.constant 0 : i32
    %c0_i32_0 = arith.constant 0 : i32
    return %arg0, %c0_i32 : i32, i32
  }
  func.func @transform_1(%arg0: i32) -> (i32, i32) {
    %c0_i32 = arith.constant 0 : i32
    %c0_i32_0 = arith.constant 0 : i32
    %c0_i32_1 = arith.constant 0 : i32
    return %c0_i32, %c0_i32_0 : i32, i32
  }
  func.func @transform_2(%arg0: i32) -> (i32, i32) {
    %c0_i32 = arith.constant 0 : i32
    %c0_i32_0 = arith.constant 0 : i32
    %c0_i32_1 = arith.constant 0 : i32
    return %c0_i32, %c0_i32_0 : i32, i32
  }
  func.func @transform_3(%arg0: i32) -> (i32, i32) {
    %c0_i32 = arith.constant 0 : i32
    %c0_i32_0 = arith.constant 0 : i32
    return %arg0, %c0_i32 : i32, i32
  }
}

</mosaic_0001>

<bundles_post_ra>
// kernel: tpu_custom_call.1
= control target key start
LH: loop header
LB: loop body
LE: loop exit
PB: predicated region body
PF: predicated region fallthrough
CT: control target
= control target key end

     0   :  { %8 = vsyncpa [#allocation3], 0  ;;  %s275_s0 = inlined_call_operand.hbm [shape: f32[8,20], index: 0, kind: input, shape index: {}]   ;;  %s276_s1 = inlined_call_operand.hbm [shape: f32[20,128], index: 1, kind: input, shape index: {}]   ;;  %s277_s2 = inlined_call_operand.vmem [shape: f32[1,128], index: 2, kind: input, shape index: {}]   ;;  %s278_s3 = inlined_call_operand.hbm [shape: f32[8,128], index: 3, kind: output, shape index: {}]  }
   0x1   :  { %9 = vsyncpa [#allocation6], 0 }
   0x2   :  { %10 = vsyncpa [#allocation4], 0  ;;  %s236_s12 = smov [#allocation2]   ;;  %s237_s14 = smov [#allocation5]  }
   0x3   :  { %s17_s13 = sshll.u32 %s236_s12, 4  ;;  %s26_s15 = sshll.u32 %s237_s14, 4  ;;  %s18_s13 = int_to_ptr.vmem [resolvable:$true] %s17_s13  ;;  %s27_s15 = int_to_ptr.vmem [resolvable:$true] %s26_s15 }
   0x4   :  { %s178_s16 = scalar_lea.vmem %s18_s13, 128  ;;  %p183_p1 = scmp.lt.s32.totalorder %s18_s13, %s18_s13 }
   0x5   :  { %p179_p0 = scmp.ne.s32.totalorder %s18_s13, %s178_s16  ;;  %p184_p2 = scmp.lt.s32.totalorder %s178_s16, %s178_s16 }
   0x7   :  { %p185_p3 = por %p184_p2, %p183_p1 }
   0x9   :  { %p186_p4 = pnand %p185_p3, %p179_p0 }
   0xb   :  { %189 = shalt.err (!%p186_p4)
}
   0xc   :  { %20 = dma.hbm_to_vmem [thread:$0]  %s275_s0, 128, %s18_s13, [#allocation3]  }
   0xd   :  { %s198_s19 = scalar_lea.vmem %s27_s15, 384  ;;  %p203_p6 = scmp.lt.s32.totalorder %s27_s15, %s27_s15 }
   0xe   :  { %p199_p5 = scmp.ne.s32.totalorder %s27_s15, %s198_s19  ;;  %p204_p7 = scmp.lt.s32.totalorder %s198_s19, %s198_s19 }
  0x10   :  { %p205_p8 = por %p204_p7, %p203_p6 }
  0x12   :  { %p206_p9 = pnand %p205_p8, %p199_p5 }
  0x14   :  { %209 = shalt.err (!%p206_p9)
}
  0x15   :  { %s238_s20 = smov 128   ;;  %s239_s21 = smov 8  }
  0x16   :  { %32 = dma.hbm_to_vmem [thread:$0]  %s276_s1, 384, %s27_s15, [#allocation6], %s238_s20, %s238_s20, %s239_s21  }
  0x17   :  { %230 = dma.done.wait [#allocation3], 128  }
  0x18   :  { %231 = vsyncadd [#allocation3], 4294967168 }
  0x19   :  { %232 = dma.done.wait [#allocation6], 384  }
  0x1a   :  { %233 = vsyncadd [#allocation6], 4294966912  ;;  %v240_v0 = vmov 0.0   ;;  %vm241_vm0 = vmmov 0   ;;  %vm56_vm1 = vcmask 1043456   ;;  %v42_v2 = vld [vmem:[#allocation5 + $0x8] sm:$0xff] }
  0x1b   :  { %154 = vmatprep.subr.mxu0 %v240_v0  ;;  %160 = vmatprep.mubr.msk.f32.mxu0 %vm241_vm0, %v240_v0  ;;  %v43_v1 = vld [vmem:[#allocation5 + $0x10] sm:$0xf]  ;;  %v41_v3 = vld [vmem:[#allocation5] sm:$0xff]  ;;  %v44_v4 = vld [vmem:[#allocation2] sm:$0xff]  ;;  %vm52_vm2 = vcmask 162816   ;;  %s242_s24 = smov [#allocation7]  }
  0x1c   :  { %155 = vmatpush3.msk.msra.mxu0 %vm56_vm1, %v43_v1  ;;  %v147_v5 = vld [vmem:[%s277_s2] ss:$0 sm:$0xff]  ;;  %s137_s25 = sshll.u32 %s242_s24, 4  ;;  %s138_s25 = int_to_ptr.vmem [resolvable:$true] %s137_s25 }
  0x1d   :  { %156 = vmatprep.subr.mxu0 %v240_v0  ;;  %s210_s26 = scalar_lea.vmem %s138_s25, 128  ;;  %p215_p11 = scmp.lt.s32.totalorder %s138_s25, %s138_s25 }
  0x1e   :  { %157 = vmatpush3.msra.mxu0 %v42_v2  ;;  %p211_p10 = scmp.ne.s32.totalorder %s138_s25, %s210_s26  ;;  %p216_p12 = scmp.lt.s32.totalorder %s210_s26, %s210_s26 }
  0x1f   :  { %158 = vmatprep.subr.mxu0 %v240_v0 }
  0x20   :  { %159 = vmatpush3.msra.mxu0 %v41_v3  ;;  %p217_p13 = por %p216_p12, %p215_p11 }
  0x21   :  { %161 = vmatmul.mubr.msk.f32.vlgmr.msra.gmra.mxu0 %vm52_vm2, %v44_v4 }
  0x22   :  { %p218_p0 = pnand %p217_p13, %p211_p10 }
  0xe1   :  { %v126_v6 = vpop.f32.mrf.mxu0 }
  0xe2   :  { %v127_v7 = vadd.f32 %v147_v5, %v126_v6 }
  0xe3   :  { %v162_v8 = vpop.f32.mrf.mxu0 }
  0xe4   :  { %130 = vst [vmem:[#allocation7] sm:$0xff] %v127_v7 }
  0xe5   :  { %221 = shalt.err (!%p218_p0)
}
  0xe6   :  { %140 = dma.vmem_to_hbm [thread:$0]  %s138_s25, 128, %s278_s3, [#allocation4]  }
  0xe7   :  { %234 = dma.done.wait [#allocation4], 128  }
  0xe8   :  { %235 = vsyncadd [#allocation4], 4294967168 }
  0xe9   :  { %144 = vsyncpa [#allocation3], 1 }
  0xea   :  { %145 = vsyncpa [#allocation6], 1 }
  0xeb   :  { %146 = vsyncpa [#allocation4], 1 }

</bundles_post_ra>
